<compile_context>
chip_gen: v6e
topology: v6e:2x2x1
jax: 0.10.0
libtpu: 0.0.40
codegen_flags: <defaults>
</compile_context>

<pallas_src>
import functools

import jax
import jax.numpy as jnp
from jax import lax
from jax.experimental import pallas as pl
from jax.experimental.pallas import tpu as pltpu


def _latent_encoder_kernel(x_ref, y_ref, pool_ref,
                           w1_ref, b1_ref,
                           w2_ref, b2_ref,
                           w3_ref, b3_ref,
                           w4_ref, b4_ref,
                           out_ref,
                           *, bc, n, dx, dy, latent_dim, mxu_dtype):
    m = bc * n

    # ---- gather the (bc*n, d) activations for this batch chunk -------------
    x = x_ref[...].reshape(m, dx)                     # (m, Dx)
    y = y_ref[...].reshape(m, dy)                     # (m, Dy)

    # ---- layer 1: Linear(Dx+Dy -> L) + ReLU ---------------------------------
    w1 = w1_ref[...]                                  # (Dx+Dy, L)
    if dx + dy <= 8:
        # Degenerate-K matmul -> broadcast multiply-adds on the VPU.
        terms = [x[:, k:k + 1] * w1[k:k + 1, :] for k in range(dx)]
        terms += [y[:, k:k + 1] * w1[dx + k:dx + k + 1, :] for k in range(dy)]
        h = terms[0]
        for t in terms[1:]:
            h = h + t
    else:
        h = (jnp.dot(x, w1[:dx, :], preferred_element_type=jnp.float32)
             + jnp.dot(y, w1[dx:, :], preferred_element_type=jnp.float32))
    h = jnp.maximum(h + b1_ref[...], 0.0)

    # ---- layers 2, 3: Linear(L -> L) + ReLU (optionally bf16 MXU operands) --
    def dense_relu(hv, w_ref, b_ref):
        prod = jnp.dot(hv.astype(mxu_dtype), w_ref[...].astype(mxu_dtype),
                       preferred_element_type=jnp.float32)
        return jnp.maximum(prod + b_ref[...], 0.0)

    h = dense_relu(h, w2_ref, b2_ref)                 # (m, L)
    h = dense_relu(h, w3_ref, b3_ref)                 # (m, L)

    # ---- mean pool over num_context BEFORE the last linear ------------------
    # pool_ref is a precomputed block-diagonal (bc, m) matrix with 1/n entries,
    # resident in VMEM (constant index map) -> no per-step mask rebuild.
    pooled = jnp.dot(pool_ref[...], h,
                     preferred_element_type=jnp.float32)              # (bc, L)

    # ---- layer 4 on the pooled representation: (bc, L) @ (L, 2L) ------------
    raw = (jnp.dot(pooled.astype(mxu_dtype), w4_ref[...].astype(mxu_dtype),
                   preferred_element_type=jnp.float32)
           + b4_ref[...])                                              # (bc, 2L)

    # Sigmoid only on the sigma lanes; single lane-dense store.
    lane = lax.broadcasted_iota(jnp.int32, raw.shape, 1)
    out_ref[...] = jnp.where(lane >= latent_dim, jax.nn.sigmoid(raw), raw)


def _pick_batch_chunk(B, N, target_rows=2048):
    """Batch elements per grid step.

    Small problems (B*N <= target_rows) run as a single grid step: per-step
    fixed cost (~0.35 us / ~600 cycles) dominates at these sizes and splitting
    across TensorCores costs more than it saves.  Larger problems use the
    fewest steps keeping <= ~target_rows matmul rows per step; multiples of 8
    are preferred so the (bc, 2L) output block stays sublane-aligned.
    """
    if B * N <= target_rows:
        return B
    best, best_aligned = 1, None
    for bc in range(1, B + 1):
        if B % bc != 0 or bc * N > target_rows:
            continue
        best = bc
        if bc % 8 == 0:
            best_aligned = bc
    return best_aligned if best_aligned is not None else best


def latent_encoder_forward(x_context, y_context, params, *,
                           use_bf16_matmul=False, target_rows=2048):
    """Pallas implementation of LatentEncoder.forward.

    Args:
      x_context: (B, N, Dx) float32
      y_context: (B, N, Dy) float32
      params: dict of weights w1..w4 stored as (in, out) and biases b1..b4.
      use_bf16_matmul: feed bf16 operands to the MXU for layers 2-4
        (numerics-affecting vs the f32 torch reference; f32 accumulation kept).

    Returns:
      (mean, sigma): each (B, 1, latent_dim) — the parameters of the Normal
      distribution returned by the torch module.
    """
    assert x_context.ndim == 3 and y_context.ndim == 3
    B, N, Dx = x_context.shape
    By, Ny, Dy = y_context.shape
    assert (By, Ny) == (B, N)
    L = params["w1"].shape[1]
    assert params["w1"].shape[0] == Dx + Dy

    bc = _pick_batch_chunk(B, N, target_rows)
    grid = (B // bc,)
    m = bc * N

    # Block-diagonal mean-pooling matrix (constant across grid steps), built
    # once here instead of from iotas inside the kernel every step.
    seg = (jnp.arange(m, dtype=jnp.int32)[None, :] // N
           == jnp.arange(bc, dtype=jnp.int32)[:, None])
    pool = jnp.where(seg, jnp.float32(1.0 / N), jnp.float32(0.0))      # (bc, m)

    # Biases as (1, out) rows so the in-kernel broadcast is a plain row add.
    b1 = params["b1"].reshape(1, -1)
    b2 = params["b2"].reshape(1, -1)
    b3 = params["b3"].reshape(1, -1)
    b4 = params["b4"].reshape(1, -1)

    def full(shape):
        nd = len(shape)
        return pl.BlockSpec(shape, lambda i, _nd=nd: (0,) * _nd)

    mxu_dtype = jnp.bfloat16 if use_bf16_matmul else jnp.float32
    kernel = functools.partial(
        _latent_encoder_kernel, bc=bc, n=N, dx=Dx, dy=Dy,
        latent_dim=L, mxu_dtype=mxu_dtype)

    out = pl.pallas_call(
        kernel,
        out_shape=jax.ShapeDtypeStruct((B, 2 * L), jnp.float32),
        grid_spec=pltpu.PrefetchScalarGridSpec(
            num_scalar_prefetch=0,
            grid=grid,
            in_specs=[
                pl.BlockSpec((bc, N, Dx), lambda i: (i, 0, 0)),
                pl.BlockSpec((bc, N, Dy), lambda i: (i, 0, 0)),
                full(pool.shape),
                full(params["w1"].shape), full(b1.shape),
                full(params["w2"].shape), full(b2.shape),
                full(params["w3"].shape), full(b3.shape),
                full(params["w4"].shape), full(b4.shape),
            ],
            out_specs=pl.BlockSpec((bc, 2 * L), lambda i: (i, 0)),
        ),
        compiler_params=pltpu.CompilerParams(
            dimension_semantics=(
                ("parallel",) if grid[0] > 1 else ("arbitrary",))),
    )(x_context, y_context, pool,
      params["w1"], b1, params["w2"], b2,
      params["w3"], b3, params["w4"], b4)

    mean = out[:, :L].reshape(B, 1, L)
    sigma = out[:, L:].reshape(B, 1, L)
    # TODO(synk): wrap (mean, sigma) in a Normal distribution object if a
    # JAX-side equivalent of torch.distributions.Normal is needed downstream.
    return mean, sigma


def init_params(key, input_dim, latent_dim):
    """Deterministic synthetic init for the pre_pooling_fn MLP."""
    dims = [(input_dim, latent_dim),
            (latent_dim, latent_dim),
            (latent_dim, latent_dim),
            (latent_dim, 2 * latent_dim)]
    params = {}
    for i, (din, dout) in enumerate(dims, start=1):
        key, kw, kb = jax.random.split(key, 3)
        scale = 1.0 / jnp.sqrt(jnp.float32(din))
        params[f"w{i}"] = jax.random.normal(kw, (din, dout), jnp.float32) * scale
        params[f"b{i}"] = jax.random.normal(kb, (dout,), jnp.float32) * 0.01
    return params


def _reference_forward(x_context, y_context, params):
    """Pure-JAX reference for correctness check (mirrors the torch module)."""
    x = jnp.concatenate((x_context, y_context), axis=-1)
    h = jnp.maximum(x @ params["w1"] + params["b1"], 0.0)
    h = jnp.maximum(h @ params["w2"] + params["b2"], 0.0)
    h = jnp.maximum(h @ params["w3"] + params["b3"], 0.0)
    h = h @ params["w4"] + params["b4"]
    h = jnp.mean(h, axis=1, keepdims=True)
    L = params["w1"].shape[1]
    return h[..., :L], jax.nn.sigmoid(h[..., L:])


if __name__ == "__main__":
    key = jax.random.PRNGKey(0)
    B, N, Dx, Dy, L = 2, 8, 2, 1, 32   # input_dim = Dx + Dy = 3, latent_dim = 32

    k1, k2, k3 = jax.random.split(key, 3)
    x_context = jax.random.normal(k1, (B, N, Dx), jnp.float32)
    y_context = jax.random.normal(k2, (B, N, Dy), jnp.float32)
    params = init_params(k3, Dx + Dy, L)

    mean, sigma = latent_encoder_forward(x_context, y_context, params)
    jax.block_until_ready((mean, sigma))

    ref_mean, ref_sigma = _reference_forward(x_context, y_context, params)
    assert mean.shape == (B, 1, L) and sigma.shape == (B, 1, L)
    assert jnp.allclose(mean, ref_mean, atol=1e-5, rtol=1e-5)
    assert jnp.allclose(sigma, ref_sigma, atol=1e-5, rtol=1e-5)
    # The torch module returns Normal(loc=mean, scale=sigma); the returned
    # (mean, sigma) pair fully determines that distribution.
    print("KERNEL_OK")
</pallas_src>

<mosaic_0001>
module attributes {stable_mosaic.version = 11 : i64} {
  func.func @_latent_encoder_kernel(%arg0: i32, %arg1: memref<2x8x2xf32, #tpu.memory_space<vmem>>, %arg2: memref<2x8x1xf32, #tpu.memory_space<vmem>>, %arg3: memref<2x16xf32, #tpu.memory_space<vmem>>, %arg4: memref<3x32xf32, #tpu.memory_space<vmem>>, %arg5: memref<1x32xf32, #tpu.memory_space<vmem>>, %arg6: memref<32x32xf32, #tpu.memory_space<vmem>>, %arg7: memref<1x32xf32, #tpu.memory_space<vmem>>, %arg8: memref<32x32xf32, #tpu.memory_space<vmem>>, %arg9: memref<1x32xf32, #tpu.memory_space<vmem>>, %arg10: memref<32x64xf32, #tpu.memory_space<vmem>>, %arg11: memref<1x64xf32, #tpu.memory_space<vmem>>, %arg12: memref<2x64xf32, #tpu.memory_space<vmem>>) attributes {dimension_semantics = [#tpu.dimension_semantics<arbitrary>], iteration_bounds = array<i64: 1>, scalar_prefetch = 0 : i64, scratch_operands = 0 : i64, tpu.core_type = #tpu.core_type<tc>, window_params = [{transform_indices = @transform_0, window_bounds = array<i64: 2, 8, 2>}, {transform_indices = @transform_1, window_bounds = array<i64: 2, 8, 1>}, {pipeline_mode = #tpu.pipeline_mode<synchronous>, transform_indices = @transform_2, window_bounds = array<i64: 2, 16>}, {pipeline_mode = #tpu.pipeline_mode<synchronous>, transform_indices = @transform_3, window_bounds = array<i64: 3, 32>}, {pipeline_mode = #tpu.pipeline_mode<synchronous>, transform_indices = @transform_4, window_bounds = array<i64: 1, 32>}, {pipeline_mode = #tpu.pipeline_mode<synchronous>, transform_indices = @transform_5, window_bounds = array<i64: 32, 32>}, {pipeline_mode = #tpu.pipeline_mode<synchronous>, transform_indices = @transform_6, window_bounds = array<i64: 1, 32>}, {pipeline_mode = #tpu.pipeline_mode<synchronous>, transform_indices = @transform_7, window_bounds = array<i64: 32, 32>}, {pipeline_mode = #tpu.pipeline_mode<synchronous>, transform_indices = @transform_8, window_bounds = array<i64: 1, 32>}, {pipeline_mode = #tpu.pipeline_mode<synchronous>, transform_indices = @transform_9, window_bounds = array<i64: 32, 64>}, {pipeline_mode = #tpu.pipeline_mode<synchronous>, transform_indices = @transform_10, window_bounds = array<i64: 1, 64>}, {transform_indices = @transform_11, window_bounds = array<i64: 2, 64>}]} {
    %c0 = arith.constant 0 : index
    %c0_0 = arith.constant 0 : index
    %c0_1 = arith.constant 0 : index
    %0 = vector.load %arg1[%c0, %c0_0, %c0_1] : memref<2x8x2xf32, #tpu.memory_space<vmem>>, vector<2x8x2xf32>
    %1 = vector.shape_cast %0 : vector<2x8x2xf32> to vector<16x2xf32>
    %c0_2 = arith.constant 0 : index
    %c0_3 = arith.constant 0 : index
    %c0_4 = arith.constant 0 : index
    %2 = vector.load %arg2[%c0_2, %c0_3, %c0_4] : memref<2x8x1xf32, #tpu.memory_space<vmem>>, vector<2x8x1xf32>
    %3 = vector.shape_cast %2 : vector<2x8x1xf32> to vector<16x1xf32>
    %c0_5 = arith.constant 0 : index
    %c0_6 = arith.constant 0 : index
    %4 = vector.load %arg4[%c0_5, %c0_6] : memref<3x32xf32, #tpu.memory_space<vmem>>, vector<3x32xf32>
    %5 = vector.extract_strided_slice %1 {offsets = [0, 0], sizes = [16, 1], strides = [1, 1]} : vector<16x2xf32> to vector<16x1xf32>
    %6 = vector.extract_strided_slice %4 {offsets = [0, 0], sizes = [1, 32], strides = [1, 1]} : vector<3x32xf32> to vector<1x32xf32>
    %7 = vector.broadcast %5 : vector<16x1xf32> to vector<16x32xf32>
    %8 = vector.broadcast %6 : vector<1x32xf32> to vector<16x32xf32>
    %9 = arith.mulf %7, %8 : vector<16x32xf32>
    %10 = vector.extract_strided_slice %1 {offsets = [0, 1], sizes = [16, 1], strides = [1, 1]} : vector<16x2xf32> to vector<16x1xf32>
    %11 = vector.extract_strided_slice %4 {offsets = [1, 0], sizes = [1, 32], strides = [1, 1]} : vector<3x32xf32> to vector<1x32xf32>
    %12 = vector.broadcast %10 : vector<16x1xf32> to vector<16x32xf32>
    %13 = vector.broadcast %11 : vector<1x32xf32> to vector<16x32xf32>
    %14 = arith.mulf %12, %13 : vector<16x32xf32>
    %15 = vector.extract_strided_slice %4 {offsets = [2, 0], sizes = [1, 32], strides = [1, 1]} : vector<3x32xf32> to vector<1x32xf32>
    %16 = vector.broadcast %3 : vector<16x1xf32> to vector<16x32xf32>
    %17 = vector.broadcast %15 : vector<1x32xf32> to vector<16x32xf32>
    %18 = arith.mulf %16, %17 : vector<16x32xf32>
    %19 = arith.addf %9, %14 : vector<16x32xf32>
    %20 = arith.addf %19, %18 : vector<16x32xf32>
    %c0_7 = arith.constant 0 : index
    %c0_8 = arith.constant 0 : index
    %21 = vector.load %arg5[%c0_7, %c0_8] : memref<1x32xf32, #tpu.memory_space<vmem>>, vector<1x32xf32>
    %22 = vector.broadcast %21 : vector<1x32xf32> to vector<16x32xf32>
    %23 = arith.addf %20, %22 : vector<16x32xf32>
    %cst = arith.constant 0.000000e+00 : f32
    %24 = vector.broadcast %cst : f32 to vector<16x32xf32>
    %25 = arith.maximumf %23, %24 : vector<16x32xf32>
    %c0_9 = arith.constant 0 : index
    %c0_10 = arith.constant 0 : index
    %26 = vector.load %arg6[%c0_9, %c0_10] : memref<32x32xf32, #tpu.memory_space<vmem>>, vector<32x32xf32>
    %cst_11 = arith.constant dense<0.000000e+00> : vector<16x32xf32>
    %27 = tpu.matmul %25, %26, %cst_11 {dimension_numbers = #tpu.dot_dimension_numbers<[1], [0], [0], [1], [0, 0, 1, 1], [], []>} : vector<16x32xf32>, vector<32x32xf32>, vector<16x32xf32> -> vector<16x32xf32>
    %c0_12 = arith.constant 0 : index
    %c0_13 = arith.constant 0 : index
    %28 = vector.load %arg7[%c0_12, %c0_13] : memref<1x32xf32, #tpu.memory_space<vmem>>, vector<1x32xf32>
    %29 = vector.broadcast %28 : vector<1x32xf32> to vector<16x32xf32>
    %30 = arith.addf %27, %29 : vector<16x32xf32>
    %cst_14 = arith.constant 0.000000e+00 : f32
    %31 = vector.broadcast %cst_14 : f32 to vector<16x32xf32>
    %32 = arith.maximumf %30, %31 : vector<16x32xf32>
    %c0_15 = arith.constant 0 : index
    %c0_16 = arith.constant 0 : index
    %33 = vector.load %arg8[%c0_15, %c0_16] : memref<32x32xf32, #tpu.memory_space<vmem>>, vector<32x32xf32>
    %cst_17 = arith.constant dense<0.000000e+00> : vector<16x32xf32>
    %34 = tpu.matmul %32, %33, %cst_17 {dimension_numbers = #tpu.dot_dimension_numbers<[1], [0], [0], [1], [0, 0, 1, 1], [], []>} : vector<16x32xf32>, vector<32x32xf32>, vector<16x32xf32> -> vector<16x32xf32>
    %c0_18 = arith.constant 0 : index
    %c0_19 = arith.constant 0 : index
    %35 = vector.load %arg9[%c0_18, %c0_19] : memref<1x32xf32, #tpu.memory_space<vmem>>, vector<1x32xf32>
    %36 = vector.broadcast %35 : vector<1x32xf32> to vector<16x32xf32>
    %37 = arith.addf %34, %36 : vector<16x32xf32>
    %cst_20 = arith.constant 0.000000e+00 : f32
    %38 = vector.broadcast %cst_20 : f32 to vector<16x32xf32>
    %39 = arith.maximumf %37, %38 : vector<16x32xf32>
    %c0_21 = arith.constant 0 : index
    %c0_22 = arith.constant 0 : index
    %40 = vector.load %arg3[%c0_21, %c0_22] : memref<2x16xf32, #tpu.memory_space<vmem>>, vector<2x16xf32>
    %cst_23 = arith.constant dense<0.000000e+00> : vector<2x32xf32>
    %41 = tpu.matmul %40, %39, %cst_23 {dimension_numbers = #tpu.dot_dimension_numbers<[1], [0], [0], [1], [0, 0, 1, 1], [], []>} : vector<2x16xf32>, vector<16x32xf32>, vector<2x32xf32> -> vector<2x32xf32>
    %c0_24 = arith.constant 0 : index
    %c0_25 = arith.constant 0 : index
    %42 = vector.load %arg10[%c0_24, %c0_25] : memref<32x64xf32, #tpu.memory_space<vmem>>, vector<32x64xf32>
    %cst_26 = arith.constant dense<0.000000e+00> : vector<2x64xf32>
    %43 = tpu.matmul %41, %42, %cst_26 {dimension_numbers = #tpu.dot_dimension_numbers<[1], [0], [0], [1], [0, 0, 1, 1], [], []>} : vector<2x32xf32>, vector<32x64xf32>, vector<2x64xf32> -> vector<2x64xf32>
    %c0_27 = arith.constant 0 : index
    %c0_28 = arith.constant 0 : index
    %44 = vector.load %arg11[%c0_27, %c0_28] : memref<1x64xf32, #tpu.memory_space<vmem>>, vector<1x64xf32>
    %45 = vector.broadcast %44 : vector<1x64xf32> to vector<2x64xf32>
    %46 = arith.addf %43, %45 : vector<2x64xf32>
    %47 = tpu.iota {dimensions = array<i32: 1>} : vector<2x64xi32>
    %c32_i32 = arith.constant 32 : i32
    %48 = vector.broadcast %c32_i32 : i32 to vector<2x64xi32>
    %49 = arith.cmpi sge, %47, %48 : vector<2x64xi32>
    %50 = arith.negf %46 : vector<2x64xf32>
    %51 = math.exp %50 : vector<2x64xf32>
    %cst_29 = arith.constant 1.000000e+00 : f32
    %52 = vector.broadcast %cst_29 : f32 to vector<2x64xf32>
    %53 = arith.addf %52, %51 : vector<2x64xf32>
    %54 = arith.divf %52, %53 : vector<2x64xf32>
    %55 = arith.select %49, %54, %46 : vector<2x64xi1>, vector<2x64xf32>
    %c0_30 = arith.constant 0 : index
    %c0_31 = arith.constant 0 : index
    %56 = vector.load %arg12[%c0_30, %c0_31] : memref<2x64xf32, #tpu.memory_space<vmem>>, vector<2x64xf32>
    tpu.vector_store %arg12[%c0_30, %c0_31], %55 {strides = array<i32>} : memref<2x64xf32, #tpu.memory_space<vmem>>, vector<2x64xf32>,
    return
  }
  func.func @transform_0(%arg0: i32) -> (i32, i32, i32) {
    %c0_i32 = arith.constant 0 : i32
    %c0_i32_0 = arith.constant 0 : i32
    %c0_i32_1 = arith.constant 0 : i32
    return %arg0, %c0_i32, %c0_i32_0 : i32, i32, i32
  }
  func.func @transform_1(%arg0: i32) -> (i32, i32, i32) {
    %c0_i32 = arith.constant 0 : i32
    %c0_i32_0 = arith.constant 0 : i32
    %c0_i32_1 = arith.constant 0 : i32
    return %arg0, %c0_i32, %c0_i32_0 : i32, i32, i32
  }
  func.func @transform_2(%arg0: i32) -> (i32, i32) {
    %c0_i32 = arith.constant 0 : i32
    %c0_i32_0 = arith.constant 0 : i32
    %c0_i32_1 = arith.constant 0 : i32
    return %c0_i32, %c0_i32_0 : i32, i32
  }
  func.func @transform_3(%arg0: i32) -> (i32, i32) {
    %c0_i32 = arith.constant 0 : i32
    %c0_i32_0 = arith.constant 0 : i32
    %c0_i32_1 = arith.constant 0 : i32
    return %c0_i32, %c0_i32_0 : i32, i32
  }
  func.func @transform_4(%arg0: i32) -> (i32, i32) {
    %c0_i32 = arith.constant 0 : i32
    %c0_i32_0 = arith.constant 0 : i32
    %c0_i32_1 = arith.constant 0 : i32
    return %c0_i32, %c0_i32_0 : i32, i32
  }
  func.func @transform_5(%arg0: i32) -> (i32, i32) {
    %c0_i32 = arith.constant 0 : i32
    %c0_i32_0 = arith.constant 0 : i32
    %c0_i32_1 = arith.constant 0 : i32
    return %c0_i32, %c0_i32_0 : i32, i32
  }
  func.func @transform_6(%arg0: i32) -> (i32, i32) {
    %c0_i32 = arith.constant 0 : i32
    %c0_i32_0 = arith.constant 0 : i32
    %c0_i32_1 = arith.constant 0 : i32
    return %c0_i32, %c0_i32_0 : i32, i32
  }
  func.func @transform_7(%arg0: i32) -> (i32, i32) {
    %c0_i32 = arith.constant 0 : i32
    %c0_i32_0 = arith.constant 0 : i32
    %c0_i32_1 = arith.constant 0 : i32
    return %c0_i32, %c0_i32_0 : i32, i32
  }
  func.func @transform_8(%arg0: i32) -> (i32, i32) {
    %c0_i32 = arith.constant 0 : i32
    %c0_i32_0 = arith.constant 0 : i32
    %c0_i32_1 = arith.constant 0 : i32
    return %c0_i32, %c0_i32_0 : i32, i32
  }
  func.func @transform_9(%arg0: i32) -> (i32, i32) {
    %c0_i32 = arith.constant 0 : i32
    %c0_i32_0 = arith.constant 0 : i32
    %c0_i32_1 = arith.constant 0 : i32
    return %c0_i32, %c0_i32_0 : i32, i32
  }
  func.func @transform_10(%arg0: i32) -> (i32, i32) {
    %c0_i32 = arith.constant 0 : i32
    %c0_i32_0 = arith.constant 0 : i32
    %c0_i32_1 = arith.constant 0 : i32
    return %c0_i32, %c0_i32_0 : i32, i32
  }
  func.func @transform_11(%arg0: i32) -> (i32, i32) {
    %c0_i32 = arith.constant 0 : i32
    %c0_i32_0 = arith.constant 0 : i32
    return %arg0, %c0_i32 : i32, i32
  }
}

</mosaic_0001>

<bundles_post_ra>
// kernel: tpu_custom_call.1
= control target key start
LH: loop header
LB: loop body
LE: loop exit
PB: predicated region body
PF: predicated region fallthrough
CT: control target
= control target key end

     0   :  { %16 = vsyncpa [#allocation3], 0  ;;  %s792_s0 = inlined_call_operand.vmem [shape: f32[2,8,2], index: 0, kind: input, shape index: {}]   ;;  %s793_s1 = inlined_call_operand.vmem [shape: f32[2,8,1], index: 1, kind: input, shape index: {}]   ;;  %s794_s2 = inlined_call_operand.vmem [shape: f32[2,16], index: 2, kind: input, shape index: {}]   ;;  %s795_s3 = inlined_call_operand.vmem [shape: f32[3,32], index: 3, kind: input, shape index: {}]   ;;  %s796_s4 = inlined_call_operand.vmem [shape: f32[1,32], index: 4, kind: input, shape index: {}]   ;;  %s797_s5 = inlined_call_operand.vmem [shape: f32[32,32], index: 5, kind: input, shape index: {}]   ;;  %s798_s6 = inlined_call_operand.vmem [shape: f32[1,32], index: 6, kind: input, shape index: {}]   ;;  %s799_s7 = inlined_call_operand.hbm [shape: f32[32,32], index: 7, kind: input, shape index: {}]   ;;  %s800_s8 = inlined_call_operand.vmem [shape: f32[1,32], index: 8, kind: input, shape index: {}]   ;;  %s801_s9 = inlined_call_operand.hbm [shape: f32[32,64], index: 9, kind: input, shape index: {}]   ;;  %s802_s10 = inlined_call_operand.vmem [shape: f32[1,64], index: 10, kind: input, shape index: {}]   ;;  %s803_s11 = inlined_call_operand.hbm [shape: f32[2,64], index: 11, kind: output, shape index: {}]  }
   0x1   :  { %17 = vsyncpa [#allocation6], 0 }
   0x2   :  { %18 = vsyncpa [#allocation4], 0  ;;  %s665_s17 = smov [#allocation2]  }
   0x3   :  { %s38_s18 = sshll.u32 %s665_s17, 4  ;;  %s39_s18 = int_to_ptr.vmem [resolvable:$true] %s38_s18 }
   0x4   :  { %s607_s19 = scalar_lea.vmem %s39_s18, 512  ;;  %p612_p1 = scmp.lt.s32.totalorder %s39_s18, %s39_s18 }
   0x5   :  { %p608_p0 = scmp.ne.s32.totalorder %s39_s18, %s607_s19  ;;  %p613_p2 = scmp.lt.s32.totalorder %s607_s19, %s607_s19 }
   0x7   :  { %p614_p3 = por %p613_p2, %p612_p1 }
   0x9   :  { %p615_p4 = pnand %p614_p3, %p608_p0 }
   0xb   :  { %618 = shalt.err (!%p615_p4)
}
   0xc   :  { %s666_s20 = smov 128   ;;  %s667_s21 = smov 8  }
   0xd   :  { %44 = dma.hbm_to_vmem [thread:$0]  %s799_s7, 512, %s39_s18, [#allocation3], %s666_s20, %s666_s20, %s667_s21  }
   0xe   :  { %s668_s24 = smov [#allocation5]  }
   0xf   :  { %s52_s25 = sshll.u32 %s668_s24, 4  ;;  %s53_s25 = int_to_ptr.vmem [resolvable:$true] %s52_s25 }
  0x10   :  { %s627_s26 = scalar_lea.vmem %s53_s25, 512  ;;  %p632_p6 = scmp.lt.s32.totalorder %s53_s25, %s53_s25 }
  0x11   :  { %p628_p5 = scmp.ne.s32.totalorder %s53_s25, %s627_s26  ;;  %p633_p7 = scmp.lt.s32.totalorder %s627_s26, %s627_s26 }
  0x13   :  { %p634_p8 = por %p633_p7, %p632_p6 }
  0x15   :  { %p635_p9 = pnand %p634_p8, %p628_p5 }
  0x17   :  { %638 = shalt.err (!%p635_p9)
}
  0x18   :  { %58 = dma.hbm_to_vmem [thread:$0]  %s801_s9, 512, %s53_s25, [#allocation6], %s666_s20, %s666_s20, %s667_s21  }
  0x19   :  { %659 = dma.done.wait [#allocation3], 512  }
  0x1a   :  { %660 = vsyncadd [#allocation3], 4294966784 }
  0x1b   :  { %661 = dma.done.wait [#allocation6], 512  }
  0x1c   :  { %662 = vsyncadd [#allocation6], 4294966784  ;;  %v669_v0 = vmov 0   ;;  %v68_v1 = vld [vmem:[%s792_s0 + $0x8] sm:$0xff]  ;;  %v67_v2 = vld [vmem:[%s792_s0] sm:$0xff]  ;;  %v670_v3 = vmov 1   ;;  %v82_v10 = vlaneseq }
  0x1d   :  { %591 = vset.pattern.permute.xlu1 %v669_v0  ;;  %589 = vset.pattern.permute.xlu0 %v669_v0  ;;  %v136_v4 = vld [vmem:[%s797_s5 + $0x18] sm:$0xff]  ;;  %v69_v5 = vld [vmem:[%s793_s1] sm:$0xff]  ;;  %v70_v6 = vld [vmem:[%s793_s1 + $0x8] sm:$0xff]  ;;  %vm144_vm0 = vcmask 261120   ;;  %v671_v51 = vmov 0.0   ;;  %vm672_vm1 = vmmov 0  }
  0x1e   :  { %79 = vperm.xlu1 %591, %v68_v1   ;;  %74 = vperm.xlu0 %589, %v67_v2   ;;  %v135_v7 = vld [vmem:[%s797_s5 + $0x10] sm:$0xff]  ;;  %v134_v8 = vld [vmem:[%s797_s5 + $0x8] sm:$0xff]  ;;  %v133_v9 = vld [vmem:[%s797_s5] sm:$0xff]  ;;  %v83_v11 = vshrl.u32 %v82_v10, 7  ;;  %vm323_vm2 = vcmask 130048   ;;  %vm491_vm4 = vcmask 517120  }
  0x1f   :  { %540 = vmatprep.subr.mxu0 %v136_v4  ;;  %v71_v16 = vld [vmem:[%s795_s3] sm:$0x7]  ;;  %v231_v40 = vld [vmem:[#allocation2 + $0x18] sm:$0xff]  ;;  %v230_v41 = vld [vmem:[#allocation2 + $0x10] sm:$0xff] }
  0x20   :  { %541 = vmatpush3.msra.mxu0 %v136_v4  ;;  %v98_v12 = vsub.s32 1, %v83_v11  ;;  %v84_v15 = vsub.s32 0, %v83_v11  ;;  %v114_v18 = vsub.s32 2, %v83_v11  ;;  %v509_v33 = vld [vmem:[%s796_s4] ss:$0 sm:$0xff]  ;;  %551 = vmatprep.subr.mxu1 %v231_v40  ;;  %v229_v42 = vld [vmem:[#allocation2 + $0x8] sm:$0xff] }
  0x21   :  { %542 = vmatprep.subr.mxu0 %v135_v7  ;;  %552 = vmatpush3.msra.mxu1 %v231_v40  ;;  %v228_v43 = vld [vmem:[#allocation2] sm:$0xff]  ;;  %v400_v52 = vld [vmem:[#allocation5 + $0x18] sm:$0xff]  ;;  %v399_v53 = vld [vmem:[#allocation5 + $0x10] sm:$0xff] }
  0x22   :  { %592 = vset.pattern.permute.xlu1 %v670_v3  ;;  %590 = vset.pattern.permute.xlu0 %v670_v3  ;;  %v99_v17 = vrot.slane %v71_v16, %v98_v12  ;;  %v85_v19 = vrot.slane %v71_v16, %v84_v15  ;;  %v115_v24 = vrot.slane %v71_v16, %v114_v18  ;;  %v510_v44 = vld [vmem:[%s798_s6] ss:$0 sm:$0xff]  ;;  %v398_v54 = vld [vmem:[#allocation5 + $0x8] sm:$0xff] }
  0x23   :  { %93 = vperm.xlu1 %592, %v68_v1   ;;  %89 = vperm.xlu0 %590, %v67_v2   ;;  %v513_v55 = vld [vmem:[%s800_s8] ss:$0 sm:$0xff] }
  0x24   :  { %543 = vmatpush3.msra.mxu0 %v135_v7  ;;  %553 = vmatprep.subr.mxu1 %v230_v41  ;;  %v322_v62 = vld [vmem:[%s794_s2] sm:$0x3]  ;;  %s673_s2 = smov [#allocation7]  }
  0x25   :  { %544 = vmatprep.subr.mxu0 %v134_v8  ;;  %554 = vmatpush3.msra.mxu1 %v230_v41  ;;  %v397_v63 = vld [vmem:[#allocation5] sm:$0xff]  ;;  %s499_s7 = sshll.u32 %s673_s2, 4  ;;  %s500_s7 = int_to_ptr.vmem [resolvable:$true] %s499_s7 }
  0x26   :  { %545 = vmatpush3.msra.mxu0 %v134_v8  ;;  %555 = vmatprep.subr.mxu1 %v229_v42  ;;  %v517_v2 = vld [vmem:[%s802_s10] ss:$0 sm:$0xff]  ;;  %s639_s29 = scalar_lea.vmem %s500_s7, 32  ;;  %p644_p11 = scmp.lt.s32.totalorder %s500_s7, %s500_s7 }
  0x27   :  { %593 = vset.pattern.permute.xlu1 %v669_v0  ;;  %594 = vset.pattern.permute.xlu0 %v669_v0  ;;  %p640_p10 = scmp.ne.s32.totalorder %s500_s7, %s639_s29  ;;  %p645_p12 = scmp.lt.s32.totalorder %s639_s29, %s639_s29 }
  0x28   :  { %104 = vperm.xlu1 %593, %v69_v5   ;;  %109 = vperm.xlu0 %594, %v70_v6  }
  0x29   :  { %546 = vmatprep.subr.mxu0 %v133_v9  ;;  %556 = vmatpush3.msra.mxu1 %v229_v42  ;;  %p646_p13 = por %p645_p12, %p644_p11 }
  0x2a   :  { %547 = vmatpush3.msra.mxu0 %v133_v9  ;;  %557 = vmatprep.subr.mxu1 %v228_v43  ;;  %v482_v9 = vand.u32 127, %v82_v10 }
  0x2b   :  { %558 = vmatpush3.msra.mxu1 %v228_v43  ;;  %562 = vmatprep.subr.mxu0 %v671_v51  ;;  %p647_p0 = pnand %p646_p13, %p640_p10 }
  0x2c   :  { %569 = vmatprep.subr.mxu1 %v671_v51  ;;  %vm483_vm3 = vcmp.ge.s32.totalorder %v482_v9, 32 }
  0x99   :  { %v80_v13 = vpop.permute.xlu1 %79  ;;  %v75_v14 = vpop.permute.xlu0 %74 }
  0x9a   :  { %v87_v25 = vmul.f32 %v85_v19, %v80_v13  ;;  %v86_v26 = vmul.f32 %v85_v19, %v75_v14 }
  0x9e   :  { %v94_v20 = vpop.permute.xlu1 %93  ;;  %v90_v21 = vpop.permute.xlu0 %89 }
  0x9f   :  { %v101_v22 = vmul.f32 %v99_v17, %v94_v20  ;;  %v100_v23 = vmul.f32 %v99_v17, %v90_v21 }
  0xa1   :  { %v119_v29 = vadd.f32 %v101_v22, %v87_v25  ;;  %v118_v30 = vadd.f32 %v100_v23, %v86_v26 }
  0xa3   :  { %v105_v27 = vpop.permute.xlu1 %104  ;;  %v110_v28 = vpop.permute.xlu0 %109 }
  0xa4   :  { %v116_v31 = vmul.f32 %v115_v24, %v105_v27  ;;  %v117_v32 = vmul.f32 %v115_v24, %v110_v28 }
  0xa6   :  { %v120_v34 = vadd.f32 %v118_v30, %v116_v31  ;;  %v121_v35 = vadd.f32 %v119_v29, %v117_v32 }
  0xa8   :  { %v129_v36 = vadd.f32 %v509_v33, %v120_v34  ;;  %v130_v37 = vadd.f32 %v509_v33, %v121_v35 }
  0xaa   :  { %v131_v38 = vmax.f32 %v129_v36, 0.0  ;;  %v132_v39 = vmax.f32 %v130_v37, 0.0 }
  0xac   :  { %548 = vmatprep.mubr.msk.f32.mxu0 %vm144_vm0, %v131_v38 }
  0xad   :  { %549 = vmatmul.mubr.msk.f32.vlgmr.msra.gmra.mxu0 %vm144_vm0, %v132_v39 }
  0xae   :  { %566 = vmatprep.mubr.msk.f32.mxu0 %vm672_vm1, %v671_v51 }
 0x16d   :  { %v550_v45 = vpop.f32.mrf.mxu0 }
 0x16e   :  { %v223_v46 = vadd.f32 %v550_v45, %v510_v44 }
 0x16f   :  { %v217_v47 = vpop.f32.mrf.mxu0 }
 0x170   :  { %v218_v48 = vadd.f32 %v510_v44, %v217_v47  ;;  %v227_v50 = vmax.f32 %v223_v46, 0.0 }
 0x172   :  { %v226_v49 = vmax.f32 %v218_v48, 0.0 }
 0x174   :  { %559 = vmatprep.mubr.msk.f32.mxu1 %vm144_vm0, %v226_v49 }
 0x175   :  { %560 = vmatmul.mubr.msk.f32.vlgmr.msra.gmra.mxu1 %vm144_vm0, %v227_v50 }
 0x176   :  { %577 = vmatprep.mubr.msk.f32.mxu1 %vm672_vm1, %v671_v51  ;;  %570 = vmatpush3.msra.mxu1 %v400_v52 }
 0x177   :  { %571 = vmatprep.subr.mxu1 %v671_v51 }
 0x178   :  { %572 = vmatpush3.msra.mxu1 %v399_v53 }
 0x179   :  { %573 = vmatprep.subr.mxu1 %v671_v51 }
 0x17a   :  { %574 = vmatpush3.msra.mxu1 %v398_v54 }
 0x17b   :  { %575 = vmatprep.subr.mxu1 %v671_v51 }
 0x17c   :  { %576 = vmatpush3.msra.mxu1 %v397_v63 }
 0x235   :  { %v561_v56 = vpop.f32.mrf.mxu1 }
 0x236   :  { %v317_v57 = vadd.f32 %v561_v56, %v513_v55 }
 0x237   :  { %v311_v58 = vpop.f32.mrf.mxu1 }
 0x238   :  { %v321_v59 = vmax.f32 %v317_v57, 0.0  ;;  %v312_v60 = vadd.f32 %v513_v55, %v311_v58 }
 0x23a   :  { %v320_v61 = vmax.f32 %v312_v60, 0.0  ;;  %563 = vmatpush3.msra.mxu0 %v321_v59 }
 0x23b   :  { %564 = vmatprep.subr.mxu0 %v671_v51 }
 0x23c   :  { %565 = vmatpush3.msra.mxu0 %v320_v61 }
 0x23d   :  { %567 = vmatmul.mubr.msk.f32.vlgmr.msra.gmra.mxu0 %vm323_vm2, %v322_v62 }
 0x2fd   :  { %v393_v0 = vpop.f32.mrf.mxu0 }
 0x2fe   :  { %578 = vmatmul.mubr.msk.f32.vlgmr.msra.gmra.mxu1 %vm144_vm0, %v393_v0 }
 0x2ff   :  { %v568_v1 = vpop.f32.mrf.mxu0 }
 0x3be   :  { %v477_v3 = vpop.f32.mrf.mxu1 }
 0x3bf   :  { %v478_v4 = vadd.f32 %v517_v2, %v477_v3 }
 0x3c0   :  { %v579_v5 = vpop.f32.mrf.mxu1 }
 0x3c1   :  { %v519_v6 = vmul.f32 -1.442695, %v478_v4 }
 0x3c3   :  { %595 = vpow2.f32 %v519_v6 }
 0x3d0   :  { %v596_v7 = vpop.eup %595 }
 0x3d1   :  { %v487_v8 = vadd.f32 1.0, %v596_v7 }
 0x3d3   :  { %597 = vrcp.f32 %v487_v8 }
 0x3e0   :  { %v598_v11 = vpop.eup %597 }
 0x3e1   :  { %v490_v12 = vsel %vm483_vm3, %v598_v11, %v478_v4 }
 0x3e2   :  { %492 = vst.msk [vmem:[#allocation7] sm:$0x3] %vm491_vm4, %v490_v12 }
 0x3e3   :  { %650 = shalt.err (!%p647_p0)
}
 0x3e4   :  { %502 = dma.vmem_to_hbm [thread:$0]  %s500_s7, 32, %s803_s11, [#allocation4]  }
 0x3e5   :  { %663 = dma.done.wait [#allocation4], 32  }
 0x3e6   :  { %664 = vsyncadd [#allocation4], 4294967264 }
 0x3e7   :  { %506 = vsyncpa [#allocation3], 1 }
 0x3e8   :  { %507 = vsyncpa [#allocation6], 1 }
 0x3e9   :  { %508 = vsyncpa [#allocation4], 1 }

</bundles_post_ra>
